<compile_context>
chip_gen: v7x
topology: tpu7x:2x2x1
jax: 0.10.0
libtpu: 0.0.40
codegen_flags: <defaults>
</compile_context>

<pallas_src>
import functools

import jax
import jax.numpy as jnp
from jax.experimental import pallas as pl
from jax.experimental.pallas import tpu as pltpu

MASK_MIN = -2.3819763e38


# ----------------------------------------------------------------------------
# small helpers
# ----------------------------------------------------------------------------
def _round_up(x, m):
    return (x + m - 1) // m * m


def _pad_rows(x, m):
    t = x.shape[0]
    tp = _round_up(t, m)
    if tp == t:
        return x
    return jnp.pad(x, ((0, tp - t), (0, 0)))


def _device_kind():
    try:
        return jax.devices()[0].device_kind.lower()
    except Exception:
        return ""


def _default_tm():
    # 256-row tiles only where VMEM is plentiful (v6e: 128 MiB); 128 on v5e / v7x.
    return 256 if "v6" in _device_kind() else 128


def _row_tile(rows):
    # clamp the token tile to the real row count (decode: pad to 16, not 256)
    return min(_default_tm(), _round_up(rows, 16))


def _pick_tile(d, candidates=(512, 256, 128)):
    for t in candidates:
        if d >= t and d % t == 0:
            return t
    return d  # small / odd dims: single full-width tile


def _vmem_limit(nbytes):
    cap = (48 << 20) if "v7" in _device_kind() else (100 << 20)
    return int(min(max(int(nbytes * 1.5), 32 << 20), cap))


def _maybe_buffered(shape, index_map, buffers):
    if buffers is None:
        return pl.BlockSpec(shape, index_map)
    # deeper weight pipelining for decode-shaped, DMA-bound calls (e.g. 3 on v6e)
    return pl.BlockSpec(shape, index_map, pipeline_mode=pl.Buffered(buffers))


def _gelu_tanh(x):
    # PyTorch F.gelu(x, approximate='tanh')
    c = jnp.float32(0.7978845608028654)  # sqrt(2/pi)
    return 0.5 * x * (1.0 + jnp.tanh(c * (x + 0.044715 * x * x * x)))


def _rms(x_f32, w_row, eps):
    var = jnp.mean(x_f32 * x_f32, axis=-1, keepdims=True)
    return x_f32 * jax.lax.rsqrt(var + eps) * (1.0 + w_row.astype(jnp.float32))


# ----------------------------------------------------------------------------
# kernel 1: input_layernorm + qkv_proj (N tiled, K = hidden untiled)
# ----------------------------------------------------------------------------
def qkv_kernel(x_ref, nw_ref, w_ref, o_ref, *, eps):
    xn = _rms(x_ref[...].astype(jnp.float32), nw_ref[...], eps).astype(jnp.bfloat16)
    o_ref[...] = jnp.dot(xn, w_ref[...],
                         preferred_element_type=jnp.float32).astype(o_ref.dtype)


def fused_norm_qkv(h2d, norm_w, w_qkv_t, *, eps, weight_buffers=None):
    """h2d: (rows, H) f32; w_qkv_t: (H, N) bf16 (q rows pre-scaled). -> (rows, N) bf16."""
    rows, H = h2d.shape
    N = w_qkv_t.shape[1]
    tm = _row_tile(rows)
    xp = _pad_rows(h2d, tm)
    Tp = xp.shape[0]
    tn = _pick_tile(N)
    vmem = (2 * tm * H * 4 + (weight_buffers or 2) * H * tn * 2 + 2 * tm * tn * 2)
    out = pl.pallas_call(
        functools.partial(qkv_kernel, eps=eps),
        out_shape=jax.ShapeDtypeStruct((Tp, N), jnp.bfloat16),
        grid_spec=pltpu.PrefetchScalarGridSpec(
            num_scalar_prefetch=0,
            grid=(Tp // tm, N // tn),
            in_specs=[
                pl.BlockSpec((tm, H), lambda i, j: (i, 0)),
                pl.BlockSpec((1, H), lambda i, j: (0, 0)),
                _maybe_buffered((H, tn), lambda i, j: (0, j), weight_buffers),
            ],
            out_specs=pl.BlockSpec((tm, tn), lambda i, j: (i, j)),
        ),
        compiler_params=pltpu.CompilerParams(
            dimension_semantics=("parallel", "parallel"),
            vmem_limit_bytes=_vmem_limit(vmem)),
    )(xp, norm_w, w_qkv_t)
    return out[:rows]


# ----------------------------------------------------------------------------
# kernel 2: attention, grid (B, num_kv_heads); KV read in-place from bf16 cache
# ----------------------------------------------------------------------------
def attention_kernel(q_ref, k_ref, v_ref, mask_ref, o_ref, *, softcap, qpk, head_dim):
    k = k_ref[...]                                   # (S, HD) bf16
    v = v_ref[...]                                   # (S, HD) bf16
    m = mask_ref[...]                                # (Tq, S) f32
    inv_cap = None if softcap is None else jnp.float32(1.0 / softcap)
    for hh in range(qpk):                            # static unroll over the GQA group
        q = q_ref[:, hh * head_dim:(hh + 1) * head_dim]          # (Tq, HD) bf16
        s = jax.lax.dot_general(q, k, (((1,), (1,)), ((), ())),
                                preferred_element_type=jnp.float32)   # (Tq, S)
        if softcap is not None:
            s = jnp.tanh(s * inv_cap) * softcap
        s = s + m
        s = s - jnp.max(s, axis=-1, keepdims=True)
        p = jnp.exp(s)
        p = p * pl.reciprocal(jnp.sum(p, axis=-1, keepdims=True), approx=True)
        o = jnp.dot(p.astype(jnp.bfloat16), v, preferred_element_type=jnp.float32)
        o_ref[:, hh * head_dim:(hh + 1) * head_dim] = o.astype(o_ref.dtype)


def pallas_attention(q3, k_cache, v_cache, mask, *, num_heads, num_kv_heads,
                     head_dim, softcap):
    """q3: (B, T, NH*HD) bf16 (scaling pre-folded); k/v_cache: (B, NKV, S, HD) bf16;
    mask: (B, 1, T, S) f32. Returns (B, T, NH*HD) bf16."""
    B, T, _ = q3.shape
    S = k_cache.shape[2]
    qpk = num_heads // num_kv_heads
    gw = qpk * head_dim
    assert gw % 128 == 0 or num_kv_heads == 1, \
        "per-group query width (qpk*head_dim) should be lane aligned"
    kern = functools.partial(attention_kernel, softcap=softcap, qpk=qpk,
                             head_dim=head_dim)
    return pl.pallas_call(
        kern,
        out_shape=jax.ShapeDtypeStruct((B, T, num_heads * head_dim), jnp.bfloat16),
        grid_spec=pltpu.PrefetchScalarGridSpec(
            num_scalar_prefetch=0,
            grid=(B, num_kv_heads),
            in_specs=[
                pl.BlockSpec((None, T, gw), lambda b, g: (b, 0, g)),
                pl.BlockSpec((None, None, S, head_dim), lambda b, g: (b, g, 0, 0)),
                pl.BlockSpec((None, None, S, head_dim), lambda b, g: (b, g, 0, 0)),
                pl.BlockSpec((None, None, T, S), lambda b, g: (b, 0, 0, 0)),
            ],
            out_specs=pl.BlockSpec((None, T, gw), lambda b, g: (b, 0, g)),
        ),
        compiler_params=pltpu.CompilerParams(
            dimension_semantics=("parallel", "parallel")),
    )(q3, k_cache, v_cache, mask)


# ----------------------------------------------------------------------------
# kernel 3: o_proj (K tiled) + post_attention_layernorm + residual add
# ----------------------------------------------------------------------------
def oproj_kernel(a_ref, w_ref, nw_ref, res_ref, o_ref, acc_ref, *, eps):
    @pl.when(pl.program_id(1) == 0)
    def _():
        acc_ref[...] = jnp.zeros_like(acc_ref)

    acc_ref[...] += jnp.dot(a_ref[...], w_ref[...],
                            preferred_element_type=jnp.float32)

    @pl.when(pl.program_id(1) == pl.num_programs(1) - 1)
    def _():
        nx = _rms(acc_ref[...], nw_ref[...], eps)
        o_ref[...] = (res_ref[...].astype(jnp.float32) + nx).astype(o_ref.dtype)


def fused_oproj_norm_residual(attn2d, w_o_t, norm_w, residual2d, *, eps,
                              weight_buffers=None):
    """attn2d: (rows, NH*HD) bf16; w_o_t: (NH*HD, H) bf16; residual2d: (rows, H) f32."""
    rows, K = attn2d.shape
    H = w_o_t.shape[1]
    tm = _row_tile(rows)
    ap = _pad_rows(attn2d, tm)
    rp = _pad_rows(residual2d, tm)
    Tp = ap.shape[0]
    tk = _pick_tile(K)
    vmem = (2 * tm * tk * 2 + (weight_buffers or 2) * tk * H * 2
            + 2 * tm * H * 4 + 2 * tm * H * 4 + tm * H * 4)
    out = pl.pallas_call(
        functools.partial(oproj_kernel, eps=eps),
        out_shape=jax.ShapeDtypeStruct((Tp, H), residual2d.dtype),
        grid_spec=pltpu.PrefetchScalarGridSpec(
            num_scalar_prefetch=0,
            grid=(Tp // tm, K // tk),
            in_specs=[
                pl.BlockSpec((tm, tk), lambda i, k: (i, k)),
                _maybe_buffered((tk, H), lambda i, k: (k, 0), weight_buffers),
                pl.BlockSpec((1, H), lambda i, k: (0, 0)),
                pl.BlockSpec((tm, H), lambda i, k: (i, 0)),
            ],
            out_specs=pl.BlockSpec((tm, H), lambda i, k: (i, 0)),
            scratch_shapes=[pltpu.VMEM((tm, H), jnp.float32)],
        ),
        compiler_params=pltpu.CompilerParams(
            dimension_semantics=("parallel", "arbitrary"),
            vmem_limit_bytes=_vmem_limit(vmem)),
    )(ap, w_o_t, norm_w, rp)
    return out[:rows]


# ----------------------------------------------------------------------------
# kernel 4: pre_ffw_ln + GemmaMLP (I tiled) + post_ffw_ln + residual add
# ----------------------------------------------------------------------------
def mlp_kernel(h1_ref, pre_nw_ref, post_nw_ref, wgu_ref, wd_ref, o_ref,
               xn_ref, acc_ref, *, eps):
    k = pl.program_id(1)

    @pl.when(k == 0)
    def _():
        xn_ref[...] = _rms(h1_ref[...].astype(jnp.float32), pre_nw_ref[...],
                           eps).astype(xn_ref.dtype)
        acc_ref[...] = jnp.zeros_like(acc_ref)

    gu = jnp.dot(xn_ref[...], wgu_ref[...],
                 preferred_element_type=jnp.float32)          # (tm, 2*bi)
    bi = gu.shape[-1] // 2
    fuse = (_gelu_tanh(gu[:, :bi]) * gu[:, bi:]).astype(wd_ref.dtype)
    acc_ref[...] += jnp.dot(fuse, wd_ref[...],
                            preferred_element_type=jnp.float32)

    @pl.when(k == pl.num_programs(1) - 1)
    def _():
        ny = _rms(acc_ref[...], post_nw_ref[...], eps)
        o_ref[...] = (h1_ref[...].astype(jnp.float32) + ny).astype(o_ref.dtype)


def fused_mlp_norm_residual(h1_2d, pre_nw, post_nw, wgu, wd_t, *, eps, block_i,
                            weight_buffers=None):
    """h1_2d: (rows, H) f32; wgu: (H, 2I) bf16 chunk-interleaved [gate_k | up_k];
    wd_t: (I, H) bf16. Returns h1 + post_norm(mlp(pre_norm(h1))) as (rows, H) f32."""
    rows, H = h1_2d.shape
    I = wd_t.shape[0]
    assert I % block_i == 0, "block_i must divide intermediate_size"
    tm = _row_tile(rows)
    xp = _pad_rows(h1_2d, tm)
    Tp = xp.shape[0]
    nbuf = weight_buffers or 2
    vmem = (2 * tm * H * 4
            + nbuf * H * (2 * block_i) * 2
            + nbuf * block_i * H * 2
            + 2 * tm * H * 4
            + tm * H * 2 + tm * H * 4)
    out = pl.pallas_call(
        functools.partial(mlp_kernel, eps=eps),
        out_shape=jax.ShapeDtypeStruct((Tp, H), h1_2d.dtype),
        grid_spec=pltpu.PrefetchScalarGridSpec(
            num_scalar_prefetch=0,
            grid=(Tp // tm, I // block_i),
            in_specs=[
                pl.BlockSpec((tm, H), lambda i, k: (i, 0)),
                pl.BlockSpec((1, H), lambda i, k: (0, 0)),
                pl.BlockSpec((1, H), lambda i, k: (0, 0)),
                _maybe_buffered((H, 2 * block_i), lambda i, k: (0, k), weight_buffers),
                _maybe_buffered((block_i, H), lambda i, k: (k, 0), weight_buffers),
            ],
            out_specs=pl.BlockSpec((tm, H), lambda i, k: (i, 0)),
            scratch_shapes=[pltpu.VMEM((tm, H), jnp.bfloat16),
                            pltpu.VMEM((tm, H), jnp.float32)],
        ),
        compiler_params=pltpu.CompilerParams(
            dimension_semantics=("parallel", "arbitrary"),
            vmem_limit_bytes=_vmem_limit(vmem)),
    )(xp, pre_nw, post_nw, wgu, wd_t)
    return out[:rows]


# ----------------------------------------------------------------------------
# JAX glue: rotary embedding (real arithmetic form of the torch complex version)
# ----------------------------------------------------------------------------
def apply_rotary_emb(x, cos, sin):
    """x: (B, T, n_heads, hd); cos/sin: (T, hd//2)."""
    h = x.shape[-1] // 2
    a, b = x[..., :h], x[..., h:]
    c = cos[None, :, None, :]
    s = sin[None, :, None, :]
    return jnp.concatenate([a * c - b * s, a * s + b * c], axis=-1)


# ----------------------------------------------------------------------------
# one-time parameter preparation (transpose / fuse / scale / bf16 at "load" time)
# ----------------------------------------------------------------------------
def prepare_decoder_params(raw, cfg, mlp_block_i):
    nh, hd = cfg["num_heads"], cfg["head_dim"]
    H = raw["w_qkv"].shape[1]
    q_size = nh * hd
    if cfg["query_pre_attn_scalar"] is not None:
        scaling = cfg["query_pre_attn_scalar"] ** -0.5
    else:
        scaling = hd ** -0.5
    # fold the query pre-attention scaling into the q rows of w_qkv (once)
    w_qkv = jnp.asarray(raw["w_qkv"], jnp.float32)
    w_qkv = w_qkv.at[:q_size].multiply(jnp.float32(scaling))

    I = raw["w_gate"].shape[0]
    n = I // mlp_block_i
    wg_t = jnp.asarray(raw["w_gate"], jnp.bfloat16).T.reshape(H, n, mlp_block_i)
    wu_t = jnp.asarray(raw["w_up"], jnp.bfloat16).T.reshape(H, n, mlp_block_i)
    # chunk-interleaved fused weight: columns [k*2bi : (k+1)*2bi] = [gate_k | up_k]
    wgu = jnp.concatenate([wg_t, wu_t], axis=2).reshape(H, 2 * I)
    return dict(
        w_qkv_t=w_qkv.astype(jnp.bfloat16).T,
        w_o_t=jnp.asarray(raw["w_o"], jnp.bfloat16).T,
        w_gate_up_fused=wgu,
        w_down_t=jnp.asarray(raw["w_down"], jnp.bfloat16).T,
        input_ln=jnp.asarray(raw["input_ln"], jnp.float32).reshape(1, H),
        post_attn_ln=jnp.asarray(raw["post_attn_ln"], jnp.float32).reshape(1, H),
        pre_ffw_ln=jnp.asarray(raw["pre_ffw_ln"], jnp.float32).reshape(1, H),
        post_ffw_ln=jnp.asarray(raw["post_ffw_ln"], jnp.float32).reshape(1, H),
        mlp_block_i=mlp_block_i,
    )


# ----------------------------------------------------------------------------
# full decoder layer (4 fused Pallas kernels + thin JAX glue on new tokens only)
# ----------------------------------------------------------------------------
def gemma2_decoder_layer(h, cos, sin, kv_write_indices, k_cache, v_cache, mask,
                         params, cfg, weight_buffers=None):
    """h: (B, T, H) f32; k/v_cache: (B, NKV, S, HD) bf16 (head-major native layout);
    mask: (B, 1, T, S) f32. Returns (h_out, k_cache, v_cache)."""
    B, T, H = h.shape
    eps = cfg["rms_norm_eps"]
    nh, nkv, hd = cfg["num_heads"], cfg["num_kv_heads"], cfg["head_dim"]
    q_size, kv_size = nh * hd, nkv * hd
    x2d = h.reshape(B * T, H)

    # --- attention block (input_layernorm fused into the qkv kernel) ---
    qkv = fused_norm_qkv(x2d, params["input_ln"], params["w_qkv_t"], eps=eps,
                         weight_buffers=weight_buffers)
    xq = qkv[:, :q_size].reshape(B, T, nh, hd)
    xk = qkv[:, q_size:q_size + kv_size].reshape(B, T, nkv, hd)
    xv = qkv[:, q_size + kv_size:].reshape(B, T, nkv, hd)
    xq = apply_rotary_emb(xq, cos, sin)
    xk = apply_rotary_emb(xk, cos, sin)

    # in-place cache update in the kernel's native (B, NKV, S, HD) bf16 layout
    # (only new-token activations are transposed; the cache itself never is)
    k_cache = k_cache.at[:, :, kv_write_indices].set(
        jnp.transpose(xk, (0, 2, 1, 3)).astype(k_cache.dtype))
    v_cache = v_cache.at[:, :, kv_write_indices].set(
        jnp.transpose(xv, (0, 2, 1, 3)).astype(v_cache.dtype))

    m = mask
    if cfg["attn_type"] == "LOCAL_SLIDING" and cfg["sliding_window_size"] is not None:
        # TODO(synk): band assumes query absolute position 0 (same as the torch ref).
        ones = jnp.ones_like(m)
        sliding = (jnp.triu(ones, -cfg["sliding_window_size"] + 1)
                   * jnp.tril(ones, cfg["sliding_window_size"] - 1))
        m = jnp.where(sliding == 1, m, MASK_MIN)

    q3 = xq.reshape(B, T, nh * hd).astype(jnp.bfloat16)   # scaling already in w_qkv
    attn = pallas_attention(q3, k_cache, v_cache, m,
                            num_heads=nh, num_kv_heads=nkv, head_dim=hd,
                            softcap=cfg["attn_logit_softcapping"])
    attn2d = attn.reshape(B * T, nh * hd)                 # already (b, t, head, d) order

    # --- o_proj + post_attention_layernorm + residual (one kernel) ---
    h1 = fused_oproj_norm_residual(attn2d, params["w_o_t"], params["post_attn_ln"],
                                   x2d, eps=eps, weight_buffers=weight_buffers)

    # --- pre_ffw_ln + MLP + post_ffw_ln + residual (one kernel) ---
    h2 = fused_mlp_norm_residual(h1, params["pre_ffw_ln"], params["post_ffw_ln"],
                                 params["w_gate_up_fused"], params["w_down_t"],
                                 eps=eps, block_i=params["mlp_block_i"],
                                 weight_buffers=weight_buffers)
    return h2.reshape(B, T, H), k_cache, v_cache


# ----------------------------------------------------------------------------
# pure-JAX reference (mirrors the torch module, with matching bf16 roundings)
# ----------------------------------------------------------------------------
def gemma2_decoder_layer_ref(h, cos, sin, kv_write_indices, k_cache, v_cache,
                             mask, raw, cfg):
    B, T, H = h.shape
    eps = cfg["rms_norm_eps"]
    nh, nkv, hd = cfg["num_heads"], cfg["num_kv_heads"], cfg["head_dim"]
    q_size, kv_size = nh * hd, nkv * hd

    def rms(x, w):
        xf = x.astype(jnp.float32)
        var = jnp.mean(xf * xf, axis=-1, keepdims=True)
        return xf * jax.lax.rsqrt(var + eps) * (1.0 + w.astype(jnp.float32))

    def lin(x, w):   # w in PyTorch (out, in) layout; mirror kernel bf16 rounding
        wb = jnp.asarray(w, jnp.bfloat16).astype(jnp.float32)
        xb = x.astype(jnp.bfloat16).astype(jnp.float32)
        return xb @ wb.T

    residual = h
    hs = rms(h, raw["input_ln"])
    qkv = lin(hs, raw["w_qkv"])
    xq = qkv[..., :q_size].reshape(B, T, nh, hd)
    xk = qkv[..., q_size:q_size + kv_size].reshape(B, T, nkv, hd)
    xv = qkv[..., q_size + kv_size:].reshape(B, T, nkv, hd)
    xq = apply_rotary_emb(xq, cos, sin)
    xk = apply_rotary_emb(xk, cos, sin)
    k_cache = k_cache.at[:, kv_write_indices].set(xk)
    v_cache = v_cache.at[:, kv_write_indices].set(xv)
    qpk = nh // nkv
    key = jnp.repeat(k_cache, qpk, axis=2)
    value = jnp.repeat(v_cache, qpk, axis=2)
    q = jnp.transpose(xq, (0, 2, 1, 3))
    k = jnp.transpose(key, (0, 2, 1, 3))
    v = jnp.transpose(value, (0, 2, 1, 3))
    if cfg["query_pre_attn_scalar"] is not None:
        scaling = cfg["query_pre_attn_scalar"] ** -0.5
    else:
        scaling = hd ** -0.5
    m = mask
    if cfg["attn_type"] == "LOCAL_SLIDING" and cfg["sliding_window_size"] is not None:
        ones = jnp.ones_like(m)
        sliding = (jnp.triu(ones, -cfg["sliding_window_size"] + 1)
                   * jnp.tril(ones, cfg["sliding_window_size"] - 1))
        m = jnp.where(sliding == 1, m, MASK_MIN)
    qb = (q * scaling).astype(jnp.bfloat16).astype(jnp.float32)
    kb = k.astype(jnp.bfloat16).astype(jnp.float32)
    scores = jnp.einsum("bhtd,bhsd->bhts", qb, kb)
    if cfg["attn_logit_softcapping"] is not None:
        cap = cfg["attn_logit_softcapping"]
        scores = jnp.tanh(scores / cap) * cap
    scores = scores + m
    scores = scores - jnp.max(scores, axis=-1, keepdims=True)
    p = jnp.exp(scores)
    p = p / jnp.sum(p, axis=-1, keepdims=True)
    pb = p.astype(jnp.bfloat16).astype(jnp.float32)
    vb = v.astype(jnp.bfloat16).astype(jnp.float32)
    attn = jnp.einsum("bhts,bhsd->bhtd", pb, vb)
    attn = jnp.transpose(attn, (0, 2, 1, 3)).reshape(B, T, -1)
    out = lin(attn, raw["w_o"])
    h1 = residual + rms(out, raw["post_attn_ln"])

    residual = h1
    hs = rms(h1, raw["pre_ffw_ln"])
    wg = jnp.asarray(raw["w_gate"], jnp.bfloat16).astype(jnp.float32)
    wu = jnp.asarray(raw["w_up"], jnp.bfloat16).astype(jnp.float32)
    wd = jnp.asarray(raw["w_down"], jnp.bfloat16).astype(jnp.float32)
    xb = hs.astype(jnp.bfloat16).astype(jnp.float32)
    gate = 0.5 * (xb @ wg.T) * (1.0 + jnp.tanh(
        jnp.float32(0.7978845608028654) * ((xb @ wg.T) + 0.044715 * (xb @ wg.T) ** 3)))
    up = xb @ wu.T
    fuse = (gate * up).astype(jnp.bfloat16).astype(jnp.float32)
    mlp_out = fuse @ wd.T
    h2 = residual + rms(mlp_out, raw["post_ffw_ln"])
    return h2, k_cache, v_cache


# ----------------------------------------------------------------------------
# demo
# ----------------------------------------------------------------------------
if __name__ == "__main__":
    B, T, S = 2, 8, 16                 # batch, input_len, kv-cache length
    H, I = 256, 512                    # hidden, intermediate
    NH, NKV, HD = 4, 2, 128            # heads, kv heads (GQA), head_dim

    cfg = dict(num_heads=NH, num_kv_heads=NKV, head_dim=HD,
               hidden_size=H, intermediate_size=I, rms_norm_eps=1e-6,
               attn_logit_softcapping=50.0, query_pre_attn_scalar=HD,
               attn_type="GLOBAL", sliding_window_size=None)

    key = jax.random.PRNGKey(0)
    ks = jax.random.split(key, 10)
    h = jax.random.normal(ks[0], (B, T, H), dtype=jnp.float32)
    raw = dict(
        w_qkv=jax.random.normal(ks[1], ((NH + 2 * NKV) * HD, H), jnp.float32) * 0.05,
        w_o=jax.random.normal(ks[2], (H, NH * HD), jnp.float32) * 0.05,
        w_gate=jax.random.normal(ks[3], (I, H), jnp.float32) * 0.05,
        w_up=jax.random.normal(ks[4], (I, H), jnp.float32) * 0.05,
        w_down=jax.random.normal(ks[5], (H, I), jnp.float32) * 0.05,
        input_ln=jax.random.normal(ks[6], (H,), jnp.float32) * 0.1,
        post_attn_ln=jax.random.normal(ks[7], (H,), jnp.float32) * 0.1,
        pre_ffw_ln=jax.random.normal(ks[8], (H,), jnp.float32) * 0.1,
        post_ffw_ln=jax.random.normal(ks[9], (H,), jnp.float32) * 0.1,
    )
    params = prepare_decoder_params(raw, cfg, mlp_block_i=256)

    # rotary frequencies for positions 0..T-1
    pos = jnp.arange(T, dtype=jnp.float32)
    inv_freq = 1.0 / (10000.0 ** (jnp.arange(0, HD, 2, dtype=jnp.float32) / HD))
    angles = pos[:, None] * inv_freq[None, :]
    cos, sin = jnp.cos(angles), jnp.sin(angles)

    kv_write_indices = jnp.arange(T, dtype=jnp.int32)
    # kernel path: bf16 cache in native head-major (B, NKV, S, HD) layout
    k_cache = jnp.zeros((B, NKV, S, HD), jnp.bfloat16)
    v_cache = jnp.zeros((B, NKV, S, HD), jnp.bfloat16)
    # reference path: torch-style f32 (B, S, NKV, HD) cache
    k_cache_ref = jnp.zeros((B, S, NKV, HD), jnp.float32)
    v_cache_ref = jnp.zeros((B, S, NKV, HD), jnp.float32)

    row = jnp.arange(T)[:, None]
    col = jnp.arange(S)[None, :]
    mask = jnp.where(col <= row, 0.0, MASK_MIN).astype(jnp.float32)
    mask = jnp.broadcast_to(mask[None, None], (B, 1, T, S))

    out, kc, vc = gemma2_decoder_layer(h, cos, sin, kv_write_indices,
                                       k_cache, v_cache, mask, params, cfg)
    jax.block_until_ready(out)

    ref, kref, vref = gemma2_decoder_layer_ref(h, cos, sin, kv_write_indices,
                                               k_cache_ref, v_cache_ref, mask,
                                               raw, cfg)

    err = float(jnp.max(jnp.abs(out - ref)))
    assert jnp.allclose(out, ref, atol=3e-2, rtol=3e-2), (
        "output mismatch, max abs diff = %e" % err)
    kc_f = jnp.transpose(kc, (0, 2, 1, 3)).astype(jnp.float32)
    vc_f = jnp.transpose(vc, (0, 2, 1, 3)).astype(jnp.float32)
    assert jnp.allclose(kc_f, kref, atol=2e-2, rtol=2e-2), "k_cache mismatch"
    assert jnp.allclose(vc_f, vref, atol=2e-2, rtol=2e-2), "v_cache mismatch"

    print("KERNEL_OK")
</pallas_src>

<mosaic_0001>
module attributes {stable_mosaic.version = 11 : i64} {
  func.func @qkv_kernel(%arg0: i32, %arg1: i32, %arg2: memref<16x256xf32, #tpu.memory_space<vmem>>, %arg3: memref<1x256xf32, #tpu.memory_space<vmem>>, %arg4: memref<256x512xbf16, #tpu.memory_space<vmem>>, %arg5: memref<16x512xbf16, #tpu.memory_space<vmem>>) attributes {dimension_semantics = [#tpu.dimension_semantics<parallel>, #tpu.dimension_semantics<parallel>], iteration_bounds = array<i64: 1, 2>, scalar_prefetch = 0 : i64, scratch_operands = 0 : i64, tpu.core_type = #tpu.core_type<tc>, window_params = [{transform_indices = @transform_0, window_bounds = array<i64: 16, 256>}, {pipeline_mode = #tpu.pipeline_mode<synchronous>, transform_indices = @transform_1, window_bounds = array<i64: 1, 256>}, {transform_indices = @transform_2, window_bounds = array<i64: 256, 512>}, {transform_indices = @transform_3, window_bounds = array<i64: 16, 512>}]} {
    %c0 = arith.constant 0 : index
    %c0_0 = arith.constant 0 : index
    %0 = vector.load %arg2[%c0, %c0_0] : memref<16x256xf32, #tpu.memory_space<vmem>>, vector<16x256xf32>
    %c0_1 = arith.constant 0 : index
    %c0_2 = arith.constant 0 : index
    %1 = vector.load %arg3[%c0_1, %c0_2] : memref<1x256xf32, #tpu.memory_space<vmem>>, vector<1x256xf32>
    %2 = arith.mulf %0, %0 : vector<16x256xf32>
    %cst = arith.constant dense<0.000000e+00> : vector<16xf32>
    %3 = vector.multi_reduction <add>, %2, %cst [1] : vector<16x256xf32> to vector<16xf32>
    %4 = vector.shape_cast %3 : vector<16xf32> to vector<16x1xf32>
    %cst_3 = arith.constant 2.560000e+02 : f32
    %5 = vector.broadcast %cst_3 : f32 to vector<16x1xf32>
    %6 = arith.divf %4, %5 : vector<16x1xf32>
    %cst_4 = arith.constant 9.99999997E-7 : f32
    %7 = vector.broadcast %cst_4 : f32 to vector<16x1xf32>
    %8 = arith.addf %6, %7 : vector<16x1xf32>
    %9 = math.rsqrt %8 : vector<16x1xf32>
    %10 = vector.broadcast %9 : vector<16x1xf32> to vector<16x256xf32>
    %11 = arith.mulf %0, %10 : vector<16x256xf32>
    %cst_5 = arith.constant 1.000000e+00 : f32
    %12 = vector.broadcast %cst_5 : f32 to vector<1x256xf32>
    %13 = arith.addf %12, %1 : vector<1x256xf32>
    %14 = vector.broadcast %13 : vector<1x256xf32> to vector<16x256xf32>
    %15 = arith.mulf %11, %14 : vector<16x256xf32>
    %16 = arith.truncf %15 : vector<16x256xf32> to vector<16x256xbf16>
    %c0_6 = arith.constant 0 : index
    %c0_7 = arith.constant 0 : index
    %17 = vector.load %arg4[%c0_6, %c0_7] : memref<256x512xbf16, #tpu.memory_space<vmem>>, vector<256x512xbf16>
    %cst_8 = arith.constant dense<0.000000e+00> : vector<16x512xf32>
    %18 = tpu.matmul %16, %17, %cst_8 {dimension_numbers = #tpu.dot_dimension_numbers<[1], [0], [0], [1], [0, 0, 1, 1], [], []>} : vector<16x256xbf16>, vector<256x512xbf16>, vector<16x512xf32> -> vector<16x512xf32>
    %19 = arith.truncf %18 : vector<16x512xf32> to vector<16x512xbf16>
    %c0_9 = arith.constant 0 : index
    %c0_10 = arith.constant 0 : index
    %20 = vector.load %arg5[%c0_9, %c0_10] : memref<16x512xbf16, #tpu.memory_space<vmem>>, vector<16x512xbf16>
    tpu.vector_store %arg5[%c0_9, %c0_10], %19 {strides = array<i32>} : memref<16x512xbf16, #tpu.memory_space<vmem>>, vector<16x512xbf16>,
    return
  }
  func.func @transform_0(%arg0: i32, %arg1: i32) -> (i32, i32) {
    %c0_i32 = arith.constant 0 : i32
    %c0_i32_0 = arith.constant 0 : i32
    return %arg0, %c0_i32 : i32, i32
  }
  func.func @transform_1(%arg0: i32, %arg1: i32) -> (i32, i32) {
    %c0_i32 = arith.constant 0 : i32
    %c0_i32_0 = arith.constant 0 : i32
    %c0_i32_1 = arith.constant 0 : i32
    return %c0_i32, %c0_i32_0 : i32, i32
  }
  func.func @transform_2(%arg0: i32, %arg1: i32) -> (i32, i32) {
    %c0_i32 = arith.constant 0 : i32
    %c0_i32_0 = arith.constant 0 : i32
    return %c0_i32, %arg1 : i32, i32
  }
  func.func @transform_3(%arg0: i32, %arg1: i32) -> (i32, i32) {
    %c0_i32 = arith.constant 0 : i32
    return %arg0, %arg1 : i32, i32
  }
}

</mosaic_0001>

<bundles_post_ra>
// kernel: tpu_custom_call.1
= control target key start
LH: loop header
LB: loop body
LE: loop exit
PB: predicated region body
PF: predicated region fallthrough
CT: control target
= control target key end

     0   :  { %8 = vsyncpa [#allocation3], 0  ;;  %s1648_s0 = inlined_call_operand.hbm [shape: f32[16,256], index: 0, kind: input, shape index: {}]   ;;  %s1649_s1 = inlined_call_operand.vmem [shape: f32[1,256], index: 1, kind: input, shape index: {}]   ;;  %s1650_s2 = inlined_call_operand.hbm [shape: bf16[256,1024], index: 2, kind: input, shape index: {}]   ;;  %s1651_s3 = inlined_call_operand.hbm [shape: bf16[16,1024], index: 3, kind: output, shape index: {}]  }
   0x1   :  { %9 = vsyncpa [#allocation6], 0 }
   0x2   :  { %11 = vsyncpa [#allocation6 + $0x1], 0 }
   0x3   :  { %12 = vsyncpa [#allocation4], 0 }
   0x4   :  { %14 = vsyncpa [#allocation4 + $0x1], 0  ;;  %s1333_s12 = smov 0   ;;  %s1335_s13 = smov 0  }
   0x5   :  { %s1337_s14 = smov 0   ;;  %s1339_s15 = smov 0  }
   0x6   :  { %s1341_s16 = smov 0   ;;  %s1343_s17 = smov 0  }
   0x7 LB: > { %s888_s18 = sadd.s32 4294967295, %s1302_s17   ;;  %s889_s19 = sadd.s32 4294967294, %s1302_s17   ;;  %s1302_s17 = sphi %s1343_s17, %s20_s17   ;;  %s1298_s16 = sphi %s1341_s16, %s1679_s16   ;;  %s1294_s15 = sphi %s1339_s15, %s1678_s15   ;;  %s1290_s14 = sphi %s1337_s14, %s1677_s14   ;;  %s1286_s13 = sphi %s1335_s13, %s1676_s13   ;;  %s1282_s12 = sphi %s1333_s12, %s1675_s12  }
   0x8   : > { %p93_p0 = scmp.ne.s32.totalorder %s1290_s14, %s1286_s13  ;;  %p94_p1 = scmp.eq.s32.totalorder %s1302_s17, 0 }
   0x9   : > { %p99_p2 = scmp.ne.s32.totalorder %s1286_s13, %s1282_s12  ;;  %p1370_p3 = scmp.eq.s32.totalorder %s888_s18, 0 }
   0xa   : > { %p1374_p4 = por %p94_p1, %p93_p0  ;;  %p125_p5 = scmp.eq.s32.totalorder %s888_s18, 1 }
   0xb   : > { %s1659_s20 = scalar_select %p1370_p3, 1, 0 }
   0xc   : > { %p1380_p6 = por %p1370_p3, %p99_p2  ;;  %p131_p7 = scmp.eq.s32.totalorder %s889_s19, 1 }
   0xd   : > { %p1384_p8 = por %p125_p5, %p93_p0  ;;  %p890_p9 = scmp.ge.s32.totalorder %s1302_s17, 1 }
   0xe   : > { %s1661_s22 = scalar_select %p1380_p6, 1, 0 }
   0xf   : > { %s1662_s23 = scalar_select %p1384_p8, 1, 0 }
  0x10   : > { %p1389_p10 = por %p131_p7, %p99_p2  ;;  %p138_p11 = scmp.lt.s32.totalorder %s1302_s17, 3 }
  0x11   : > { %s1304_s26 = smov [#allocation2]   ;;  %p1000_p1 = scmp.lt.s32.totalorder %s1302_s17, 2 }
  0x12   : > { %s1663_s24 = scalar_select %p1389_p10, 1, 0 }
  0x13   : > { %p1394_p12 = pnand %p890_p9, %p138_p11  ;;  %s154_s27 = sshll.u32 %s1304_s26, 4  ;;  %s1398_s27 = int_to_ptr.vmem [resolvable:$true] %s154_s27 }
  0x14   : > { %p1412_p2 = pnand %p1000_p1, %p1374_p4  ;;  %s29_s30 = sadd.s32 1, %s1298_s16 }
  0x15   : > { %s1664_s25 = scalar_select %p1394_p12, 1, 0 }
  0x16   : > { %p987_p13 = pneg %p1394_p12  ;;  %s1158_s6 = scalar_lea.hbm %s1648_s0, 512 }
  0x17   : > { %s1666_s29 = scalar_select %p1412_p2, 1, 0 }
  0x18   : > { %p1406_p5 = pnand %p987_p13, %p1370_p3  ;;  %p1159_p7 = scmp.ne.s32.totalorder %s1648_s0, %s1158_s6 }
  0x19   : > { %p1165_p4 = scmp.lt.u32.totalorder %s1158_s6, %s1648_s0 }
  0x1a   : > { %p1160_p9 = pneg %p1406_p5 }
  0x1c   : > { %p1161_p11 = pnand %p1160_p9, %p1159_p7 }
  0x1e   : > { %p1162_p13 = pneg %p1161_p11 }
  0x20   : > { %p1167_p1 = pnand %p1165_p4, %p1162_p13 }
  0x22   : > { %1170 = shalt.err (!%p1167_p1)
}
  0x23   : > { %s1171_s11 = scalar_lea.vmem %s1398_s27, 512  ;;  %p1179_p6 = scmp.lt.s32.totalorder %s1398_s27, %s1398_s27 }
  0x24   : > { %p1172_p0 = scmp.ne.s32.totalorder %s1398_s27, %s1171_s11  ;;  %p1180_p3 = scmp.lt.s32.totalorder %s1171_s11, %s1171_s11 }
  0x26   : > { %p1174_p10 = pnand %p1172_p0, %p1160_p9  ;;  %p1181_p12 = por %p1180_p3, %p1179_p6 }
  0x28   : > { %p1175_p8 = pneg %p1174_p10 }
  0x2a   : > { %p1182_p2 = pnand %p1181_p12, %p1175_p8 }
  0x2c   : > { %1185 = shalt.err (!%p1182_p2)
}
  0x2d   : > { %s1658_s18 = smov 256   ;;  %s1306_s19 = smov 16  }
  0x2e   : > { %990 = dma.hbm_to_vmem [thread:$0]  (!%p1406_p5), %s1648_s0, 512, %s1398_s27, [#allocation3], %s1658_s18, %s1658_s18, %s1306_s19  }
  0x2f   : > { %p30_p3 = scmp.ge.s32.totalorder %s29_s30, 2  ;;  %s86_s4 = sadd.s32 1, %s1290_s14 }
  0x30   : > { %s171_s5 = sand.u32 1, %s1290_s14   ;;  %s973_s8 = sshll.u32 %s1298_s16, 8 }
  0x31   : > { %s1681_s30 = smov (%p30_p3, %s29_s30), 0  ;;  %s893_s6 = sshll.u32 %s171_s5, 9 }
  0x32   : > { %s83_s7 = ssub.s32 %s1298_s16, %s1681_s30  ;;  %s1451_s10 = scalar_lea.hbm %s1650_s2, %s973_s8 }
  0x33   : > { %p84_p6 = scmp.eq.s32.totalorder %s83_s7, 0  ;;  %s175_s27 = scalar_lea.vmem [#allocation5], %s893_s6 }
  0x34   : > { %s182_s11 = sshll.u32 %s175_s27, 4  ;;  %s1458_s26 = scalar_lea.sflag [#allocation6], %s171_s5  ;;  %s1456_s11 = int_to_ptr.vmem [resolvable:$true] %s182_s11 }
  0x35   : > { %s1454_s21 = scalar_select %p84_p6, %s1290_s14, %s86_s4  }
  0x36   : > { %s1186_s18 = scalar_lea.hbm %s1451_s10, 8192  ;;  %p1667_p10 = scmp.ne.s32.totalorder %s1666_s29, 0 }
  0x37   : > { %p1187_p8 = scmp.ne.s32.totalorder %s1451_s10, %s1186_s18  ;;  %s1191_s28 = scalar_lea.hbm %s1650_s2, 16384 }
  0x38   : > { %p1188_p12 = pneg %p1667_p10  ;;  %p1192_p2 = scmp.lt.u32.totalorder %s1451_s10, %s1650_s2 }
  0x39   : > { %p1193_p7 = scmp.lt.u32.totalorder %s1191_s28, %s1186_s18  ;;  %p1195_p11 = scmp.lt.u32.totalorder %s1186_s18, %s1451_s10 }
  0x3a   : > { %p1189_p0 = pnand %p1188_p12, %p1187_p8 }
  0x3b   : > { %p1194_p9 = por %p1193_p7, %p1192_p2 }
  0x3c   : > { %p1190_p5 = pneg %p1189_p0 }
  0x3d   : > { %p1196_p13 = por %p1195_p11, %p1194_p9 }
  0x3f   : > { %p1197_p4 = pnand %p1196_p13, %p1190_p5 }
  0x41   : > { %1200 = shalt.err (!%p1197_p4)
}
  0x42   : > { %s1201_s4 = scalar_lea.vmem %s1456_s11, 8192  ;;  %s1307_s5 = smov [#allocation5]  }
  0x43   : > { %p1202_p1 = scmp.ne.s32.totalorder %s1456_s11, %s1201_s4  ;;  %s1206_s27 = sshll.u32 %s1307_s5, 4  ;;  %s1207_s27 = int_to_ptr.vmem [resolvable:$false] %s1206_s27 }
  0x44   : > { %s1208_s7 = scalar_lea.vmem %s1207_s27, 16384  ;;  %p1209_p8 = scmp.lt.s32.totalorder %s1456_s11, %s1207_s27 }
  0x45   : > { %p1204_p3 = pnand %p1202_p1, %p1188_p12  ;;  %p1210_p0 = scmp.lt.s32.totalorder %s1208_s7, %s1201_s4 }
  0x47   : > { %p1205_p6 = pneg %p1204_p3  ;;  %p1211_p2 = por %p1210_p0, %p1209_p8 }
  0x49   : > { %p1212_p7 = pnand %p1211_p2, %p1205_p6 }
  0x4b   : > { %1215 = shalt.err (!%p1212_p7)
}
  0x4c   : > { %s1308_s18 = smov 512   ;;  %s1668_s8 = smov 256  }
  0x4d   : > { %994 = dma.hbm_to_vmem [thread:$0]  (!%p1667_p10), %s1451_s10, 8192, %s1456_s11, %s1458_s26, %s1308_s18, %s1668_s8, %s1306_s19  }
  0x4e   : > { %p1669_p12 = scmp.ne.s32.totalorder %s1664_s25, 0 }
  0x4f   : > { %p1670_p5 = scmp.ne.s32.totalorder (!%p1669_p12), %s1659_s20, 0 }
  0x50   : > { %194 = sbr.rel (%p1669_p12) target bundleno = 498 (0x1f2), region = 32 }
  0x57   : > { %1269 = dma.done.wait (%p1670_p5), [#allocation3], 512  }
  0x58   : > { %1271 = vsyncadd (%p1670_p5), [#allocation3], 4294966784  ;;  %s1495_s28 = sand.u32 1, %s1286_s13   ;;  %p1671_p10 = scmp.ne.s32.totalorder %s1661_s22, 0 }
  0x59   : > { %s898_s29 = sshll.u32 %s1495_s28, 9  ;;  %s201_s6 = scalar_lea.sflag [#allocation6], %s1495_s28 }
  0x5a   : > { %s1499_s9 = scalar_lea.vmem [#allocation5], %s898_s29 }
  0x5b   : > { %1273 = dma.done.wait (%p1671_p10), %s201_s6, 8192  }
  0x5c   : > { %1275 = vsyncadd (%p1671_p10), %s201_s6, 4294959104  ;;  %v1505_v0 = vld [vmem:[#allocation2] sm:$0xff]  ;;  %v1507_v1 = vld [vmem:[#allocation2 + $0x8] sm:$0xff]  ;;  %s899_s25 = sshll.u32 %s1495_s28, 5  ;;  %s978_s11 = sshll.u32 %s1294_s15, 8 }
  0x5d   : > { %v1509_v2 = vld [vmem:[#allocation2 + $0x10] sm:$0xff]  ;;  %v236_v3 = vmul.f32 %v1505_v0, %v1505_v0  ;;  %v237_v4 = vmul.f32 %v1507_v1, %v1507_v1  ;;  %v1515_v5 = vld [vmem:[#allocation2 + $0x18] sm:$0xff]  ;;  %s226_s19 = scalar_lea.vmem [#allocation7], %s899_s25  ;;  %s1599_s5 = scalar_lea.hbm %s1651_s3, %s978_s11 }
  0x5e   : > { %v238_v6 = vmul.f32 %v1509_v2, %v1509_v2  ;;  %v239_v7 = vmul.f32 %v1515_v5, %v1515_v5  ;;  %v1058_v8 = vld [vmem:[%s1499_s9 + $0x4] ss:$16 sps:$4 sm:$0xff]   ;;  %v1060_v10 = vld [vmem:[%s1499_s9 + $0xc] ss:$16 sps:$4 sm:$0xff]   ;;  %v1062_v11 = vld [vmem:[%s1499_s9] ss:$16 sps:$4 sm:$0xff]  }
  0x5f   : > { %v240_v9 = vadd.f32 %v237_v4, %v236_v3  ;;  %v1063_v12 = vld [vmem:[%s1499_s9 + $0x8] ss:$16 sps:$4 sm:$0xff]   ;;  %659 = vmatprep.subr.bf16.mxu0 %v1058_v8  ;;  %v1064_v13 = vld [vmem:[%s1499_s9 + $0x24] ss:$16 sps:$4 sm:$0xff]   ;;  %702 = vmatprep.subr.bf16.mxu1 %v1060_v10  ;;  %v1066_v15 = vld [vmem:[%s1499_s9 + $0x2c] ss:$16 sps:$4 sm:$0xff]  }
  0x60   : > { %v243_v14 = vadd.f32 %v239_v7, %v238_v6  ;;  %660 = vmatpush1.bf16.msra.mxu0 %v1062_v11  ;;  %703 = vmatpush1.bf16.msra.mxu1 %v1063_v12  ;;  %v1068_v16 = vld [vmem:[%s1499_s9 + $0x20] ss:$16 sps:$4 sm:$0xff]   ;;  %v1069_v17 = vld [vmem:[%s1499_s9 + $0x28] ss:$16 sps:$4 sm:$0xff]   ;;  %v1070_v18 = vld [vmem:[%s1499_s9 + $0x44] ss:$16 sps:$4 sm:$0xff]  }
  0x61   : > { %241 = vadd.xlane.f32.xlu0 %v240_v9  ;;  %661 = vmatprep.subr.bf16.mxu0 %v1064_v13  ;;  %v1072_v19 = vld [vmem:[%s1499_s9 + $0x4c] ss:$16 sps:$4 sm:$0xff]   ;;  %v1074_v20 = vld [vmem:[%s1499_s9 + $0x40] ss:$16 sps:$4 sm:$0xff]   ;;  %v1075_v21 = vld [vmem:[%s1499_s9 + $0x48] ss:$16 sps:$4 sm:$0xff]  }
  0x62   : > { %704 = vmatprep.subr.bf16.mxu1 %v1066_v15  ;;  %v1076_v22 = vld [vmem:[%s1499_s9 + $0x64] ss:$16 sps:$4 sm:$0xff]   ;;  %v1078_v23 = vld [vmem:[%s1499_s9 + $0x6c] ss:$16 sps:$4 sm:$0xff]   ;;  %v1080_v24 = vld [vmem:[%s1499_s9 + $0x60] ss:$16 sps:$4 sm:$0xff]  }
  0x63   : > { %v1081_v25 = vld [vmem:[%s1499_s9 + $0x68] ss:$16 sps:$4 sm:$0xff]   ;;  %v1082_v26 = vld [vmem:[%s1499_s9 + $0x84] ss:$16 sps:$4 sm:$0xff]   ;;  %v1084_v27 = vld [vmem:[%s1499_s9 + $0x8c] ss:$16 sps:$4 sm:$0xff]  }
  0x64   : > { %662 = vmatpush1.bf16.msra.mxu0 %v1068_v16  ;;  %705 = vmatpush1.bf16.msra.mxu1 %v1069_v17  ;;  %v1086_v28 = vld [vmem:[%s1499_s9 + $0x80] ss:$16 sps:$4 sm:$0xff]   ;;  %v1087_v29 = vld [vmem:[%s1499_s9 + $0x88] ss:$16 sps:$4 sm:$0xff]   ;;  %v1088_v30 = vld [vmem:[%s1499_s9 + $0xa4] ss:$16 sps:$4 sm:$0xff]  }
  0x65   : > { %244 = vadd.xlane.f32.xlu0 %v243_v14  ;;  %663 = vmatprep.subr.bf16.mxu0 %v1070_v18  ;;  %v1090_v31 = vld [vmem:[%s1499_s9 + $0xac] ss:$16 sps:$4 sm:$0xff]   ;;  %v1092_v32 = vld [vmem:[%s1499_s9 + $0xa0] ss:$16 sps:$4 sm:$0xff]   ;;  %v1093_v33 = vld [vmem:[%s1499_s9 + $0xa8] ss:$16 sps:$4 sm:$0xff]  }
  0x66   : > { %706 = vmatprep.subr.bf16.mxu1 %v1072_v19  ;;  %v1094_v34 = vld [vmem:[%s1499_s9 + $0xc4] ss:$16 sps:$4 sm:$0xff]   ;;  %v1096_v35 = vld [vmem:[%s1499_s9 + $0xcc] ss:$16 sps:$4 sm:$0xff]   ;;  %v1098_v36 = vld [vmem:[%s1499_s9 + $0xc0] ss:$16 sps:$4 sm:$0xff]   ;;  %v259_v19 = vlaneseq }
  0x67   : > { %v1099_v37 = vld [vmem:[%s1499_s9 + $0xc8] ss:$16 sps:$4 sm:$0xff]   ;;  %v1100_v38 = vld [vmem:[%s1499_s9 + $0xe4] ss:$16 sps:$4 sm:$0xff]   ;;  %v1102_v39 = vld [vmem:[%s1499_s9 + $0xec] ss:$16 sps:$4 sm:$0xff]  }
  0x68   : > { %664 = vmatpush1.bf16.msra.mxu0 %v1074_v20  ;;  %707 = vmatpush1.bf16.msra.mxu1 %v1075_v21  ;;  %v1104_v40 = vld [vmem:[%s1499_s9 + $0xe0] ss:$16 sps:$4 sm:$0xff]   ;;  %v1105_v41 = vld [vmem:[%s1499_s9 + $0xe8] ss:$16 sps:$4 sm:$0xff]   ;;  %v1106_v42 = vld [vmem:[%s1499_s9 + $0x104] ss:$16 sps:$4 sm:$0xff]  }
  0x69   : > { %665 = vmatprep.subr.bf16.mxu0 %v1076_v22  ;;  %708 = vmatprep.subr.bf16.mxu1 %v1078_v23  ;;  %v1108_v43 = vld [vmem:[%s1499_s9 + $0x10c] ss:$16 sps:$4 sm:$0xff]   ;;  %v1110_v44 = vld [vmem:[%s1499_s9 + $0x100] ss:$16 sps:$4 sm:$0xff]   ;;  %v1111_v45 = vld [vmem:[%s1499_s9 + $0x108] ss:$16 sps:$4 sm:$0xff]  }
  0x6a   : > { %v1112_v46 = vld [vmem:[%s1499_s9 + $0x124] ss:$16 sps:$4 sm:$0xff]   ;;  %v1114_v47 = vld [vmem:[%s1499_s9 + $0x12c] ss:$16 sps:$4 sm:$0xff]   ;;  %v1116_v48 = vld [vmem:[%s1499_s9 + $0x120] ss:$16 sps:$4 sm:$0xff]  }
  0x6b   : > { %v1117_v49 = vld [vmem:[%s1499_s9 + $0x128] ss:$16 sps:$4 sm:$0xff]   ;;  %v1118_v50 = vld [vmem:[%s1499_s9 + $0x144] ss:$16 sps:$4 sm:$0xff]   ;;  %v1120_v51 = vld [vmem:[%s1499_s9 + $0x14c] ss:$16 sps:$4 sm:$0xff]  }
  0x6c   : > { %666 = vmatpush1.bf16.msra.mxu0 %v1080_v24  ;;  %709 = vmatpush1.bf16.msra.mxu1 %v1081_v25  ;;  %v1122_v52 = vld [vmem:[%s1499_s9 + $0x140] ss:$16 sps:$4 sm:$0xff]   ;;  %v1123_v53 = vld [vmem:[%s1499_s9 + $0x148] ss:$16 sps:$4 sm:$0xff]   ;;  %v1124_v54 = vld [vmem:[%s1499_s9 + $0x164] ss:$16 sps:$4 sm:$0xff]  }
  0x6d   : > { %667 = vmatprep.subr.bf16.mxu0 %v1082_v26  ;;  %710 = vmatprep.subr.bf16.mxu1 %v1084_v27  ;;  %v1126_v55 = vld [vmem:[%s1499_s9 + $0x16c] ss:$16 sps:$4 sm:$0xff]   ;;  %v1128_v56 = vld [vmem:[%s1499_s9 + $0x160] ss:$16 sps:$4 sm:$0xff]   ;;  %v1129_v57 = vld [vmem:[%s1499_s9 + $0x168] ss:$16 sps:$4 sm:$0xff]  }
  0x6e   : > { %v1130_v58 = vld [vmem:[%s1499_s9 + $0x184] ss:$16 sps:$4 sm:$0xff]   ;;  %v1132_v59 = vld [vmem:[%s1499_s9 + $0x18c] ss:$16 sps:$4 sm:$0xff]   ;;  %v1134_v60 = vld [vmem:[%s1499_s9 + $0x180] ss:$16 sps:$4 sm:$0xff]  }
  0x6f   : > { %v1135_v61 = vld [vmem:[%s1499_s9 + $0x188] ss:$16 sps:$4 sm:$0xff]   ;;  %v1136_v62 = vld [vmem:[%s1499_s9 + $0x1a4] ss:$16 sps:$4 sm:$0xff]   ;;  %v1138_v63 = vld [vmem:[%s1499_s9 + $0x1ac] ss:$16 sps:$4 sm:$0xff]  }
  0x70   : > { %668 = vmatpush1.bf16.msra.mxu0 %v1086_v28  ;;  %711 = vmatpush1.bf16.msra.mxu1 %v1087_v29  ;;  %v1140_v3 = vld [vmem:[%s1499_s9 + $0x1a0] ss:$16 sps:$4 sm:$0xff]   ;;  %v1141_v4 = vld [vmem:[%s1499_s9 + $0x1a8] ss:$16 sps:$4 sm:$0xff]   ;;  %v1142_v6 = vld [vmem:[%s1499_s9 + $0x1c4] ss:$16 sps:$4 sm:$0xff]  }
  0x71   : > { %669 = vmatprep.subr.bf16.mxu0 %v1088_v30  ;;  %712 = vmatprep.subr.bf16.mxu1 %v1090_v31  ;;  %v1144_v7 = vld [vmem:[%s1499_s9 + $0x1cc] ss:$16 sps:$4 sm:$0xff]   ;;  %v1146_v8 = vld [vmem:[%s1499_s9 + $0x1c0] ss:$16 sps:$4 sm:$0xff]   ;;  %v1147_v9 = vld [vmem:[%s1499_s9 + $0x1c8] ss:$16 sps:$4 sm:$0xff]  }
  0x72   : > { %v1148_v10 = vld [vmem:[%s1499_s9 + $0x1e4] ss:$16 sps:$4 sm:$0xff]   ;;  %v1150_v11 = vld [vmem:[%s1499_s9 + $0x1ec] ss:$16 sps:$4 sm:$0xff]   ;;  %v1152_v12 = vld [vmem:[%s1499_s9 + $0x1e0] ss:$16 sps:$4 sm:$0xff]  }
  0x73   : > { %v1153_v13 = vld [vmem:[%s1499_s9 + $0x1e8] ss:$16 sps:$4 sm:$0xff]   ;;  %v260_v21 = vshrl.u32 %v259_v19, 7  ;;  %v235_v22 = vld [vmem:[%s1649_s1] sm:$0x3]  ;;  %s790_s10 = sshll.u32 %s226_s19, 4  ;;  %s1594_s10 = int_to_ptr.vmem [resolvable:$true] %s790_s10 }
  0x74   : > { %670 = vmatpush1.bf16.msra.mxu0 %v1092_v32  ;;  %713 = vmatpush1.bf16.msra.mxu1 %v1093_v33  ;;  %v257_v23 = vadd.f32 1.0, %v235_v22  ;;  %s774_s15 = scalar_lea.sflag [#allocation4], %s1495_s28  ;;  %s1216_s27 = scalar_lea.vmem %s1594_s10, 512 }
  0x75   : > { %671 = vmatprep.subr.bf16.mxu0 %v1094_v34  ;;  %714 = vmatprep.subr.bf16.mxu1 %v1096_v35  ;;  %v265_v24 = vsub.s32 1, %v260_v21  ;;  %v261_v25 = vsub.s32 0, %v260_v21  ;;  %p1217_p9 = scmp.ne.s32.totalorder %s1594_s10, %s1216_s27  ;;  %p1672_p11 = scmp.ne.s32.totalorder %s1662_s23, 0 }
  0x76   : > { %s1309_s7 = smov [#allocation7]  }
  0x77   : > { %v266_v28 = vrot.slane %v257_v23, %v265_v24  ;;  %v262_v30 = vrot.slane %v257_v23, %v261_v25  ;;  %p1218_p13 = pnand %p1217_p9, %p1672_p11  ;;  %s1220_s18 = sshll.u32 %s1309_s7, 4  ;;  %s1221_s18 = int_to_ptr.vmem [resolvable:$false] %s1220_s18 }
  0x78   : > { %672 = vmatpush1.bf16.msra.mxu0 %v1098_v36  ;;  %715 = vmatpush1.bf16.msra.mxu1 %v1099_v37  ;;  %s1222_s8 = scalar_lea.vmem %s1221_s18, 1024  ;;  %p1223_p1 = scmp.lt.s32.totalorder %s1594_s10, %s1221_s18 }
  0x79   : > { %673 = vmatprep.subr.bf16.mxu0 %v1100_v38  ;;  %716 = vmatprep.subr.bf16.mxu1 %v1102_v39  ;;  %p1219_p4 = pneg %p1218_p13  ;;  %p1224_p3 = scmp.lt.s32.totalorder %s1222_s8, %s1216_s27 }
  0x7b   : > { %p1225_p6 = por %p1224_p3, %p1223_p1 }
  0x7c   : > { %674 = vmatpush1.bf16.msra.mxu0 %v1104_v40  ;;  %717 = vmatpush1.bf16.msra.mxu1 %v1105_v41 }
  0x7d   : > { %675 = vmatprep.subr.bf16.mxu0 %v1106_v42  ;;  %718 = vmatprep.subr.bf16.mxu1 %v1108_v43  ;;  %p1226_p8 = pnand %p1225_p6, %p1219_p4 }
  0x80   : > { %676 = vmatpush1.bf16.msra.mxu0 %v1110_v44  ;;  %719 = vmatpush1.bf16.msra.mxu1 %v1111_v45 }
  0x81   : > { %677 = vmatprep.subr.bf16.mxu0 %v1112_v46  ;;  %720 = vmatprep.subr.bf16.mxu1 %v1114_v47 }
  0x84   : > { %678 = vmatpush1.bf16.msra.mxu0 %v1116_v48  ;;  %721 = vmatpush1.bf16.msra.mxu1 %v1117_v49 }
  0x85   : > { %679 = vmatprep.subr.bf16.mxu0 %v1118_v50  ;;  %722 = vmatprep.subr.bf16.mxu1 %v1120_v51 }
  0x88   : > { %680 = vmatpush1.bf16.msra.mxu0 %v1122_v52  ;;  %723 = vmatpush1.bf16.msra.mxu1 %v1123_v53 }
  0x89   : > { %681 = vmatprep.subr.bf16.mxu0 %v1124_v54  ;;  %724 = vmatprep.subr.bf16.mxu1 %v1126_v55 }
  0x8c   : > { %682 = vmatpush1.bf16.msra.mxu0 %v1128_v56  ;;  %725 = vmatpush1.bf16.msra.mxu1 %v1129_v57 }
  0x8d   : > { %683 = vmatprep.subr.bf16.mxu0 %v1130_v58  ;;  %726 = vmatprep.subr.bf16.mxu1 %v1132_v59 }
  0x90   : > { %684 = vmatpush1.bf16.msra.mxu0 %v1134_v60  ;;  %727 = vmatpush1.bf16.msra.mxu1 %v1135_v61 }
  0x91   : > { %685 = vmatprep.subr.bf16.mxu0 %v1136_v62  ;;  %728 = vmatprep.subr.bf16.mxu1 %v1138_v63 }
  0x94   : > { %686 = vmatpush1.bf16.msra.mxu0 %v1140_v3  ;;  %729 = vmatpush1.bf16.msra.mxu1 %v1141_v4 }
  0x95   : > { %687 = vmatprep.subr.bf16.mxu0 %v1142_v6  ;;  %730 = vmatprep.subr.bf16.mxu1 %v1144_v7 }
  0x98   : > { %688 = vmatpush1.bf16.msra.mxu0 %v1146_v8  ;;  %731 = vmatpush1.bf16.msra.mxu1 %v1147_v9 }
  0x99   : > { %689 = vmatprep.subr.bf16.mxu0 %v1148_v10  ;;  %732 = vmatprep.subr.bf16.mxu1 %v1150_v11 }
  0x9c   : > { %690 = vmatpush1.bf16.msra.mxu0 %v1152_v12  ;;  %733 = vmatpush1.bf16.msra.mxu1 %v1153_v13 }
  0xee   : > { %v242_v14 = vpop.xlane.xlu0 %241 }
  0xef   : > { %v247_v15 = vmul.f32 0.00390625, %v242_v14 }
  0xf1   : > { %v249_v16 = vadd.f32 1e-06, %v247_v15 }
  0xf2   : > { %v245_v17 = vpop.xlane.xlu0 %244 }
  0xf3   : > { %1154 = vrsqrt.f32 %v249_v16  ;;  %v248_v18 = vmul.f32 0.00390625, %v245_v17 }
  0xf5   : > { %v250_v20 = vadd.f32 1e-06, %v248_v18 }
  0xf7   : > { %1156 = vrsqrt.f32 %v250_v20 }
  0xfd   : > { %v1155_v26 = vpop.eup %1154 }
  0xfe   : > { %v254_v27 = vmul.f32 %v1155_v26, %v1507_v1  ;;  %v253_v29 = vmul.f32 %v1155_v26, %v1505_v0 }
 0x100   : > { %v270_v34 = vmul.f32 %v266_v28, %v254_v27  ;;  %v269_v36 = vmul.f32 %v262_v30, %v253_v29 }
 0x101   : > { %v1157_v31 = vpop.eup %1156 }
 0x102   : > { %v256_v32 = vmul.f32 %v1157_v31, %v1515_v5  ;;  %v255_v33 = vmul.f32 %v1157_v31, %v1509_v2 }
 0x104   : > { %v272_v35 = vmul.f32 %v266_v28, %v256_v32  ;;  %v271_v37 = vmul.f32 %v262_v30, %v255_v33 }
 0x106   : > { %v274_v38 = vpack.c.bf16 %v272_v35, %v270_v34  ;;  %v273_v39 = vpack.c.bf16 %v271_v37, %v269_v36 }
 0x108   : > { %691 = vmatprep.mubr.bf16.mxu0 %v274_v38  ;;  %734 = vmatprep.mubr.bf16.mxu1 %v274_v38 }
 0x109   : > { %692 = vmatmul.mubr.bf16.vlgmr.msra.gmra.mrb[0].mxu0 %v273_v39  ;;  %735 = vmatmul.mubr.bf16.vlgmr.msra.gmra.mrb[0].mxu1 %v273_v39 }
 0x1dc   : > { %v693_v0 = vpop.f32.mrb[0].mxu0  ;;  %v736_v1 = vpop.f32.mrb[0].mxu1 }
 0x1dd   : > { %v695_v5 = vpop.f32.mrb[1].mxu0  ;;  %v738_v2 = vpop.f32.mrb[1].mxu1 }
 0x1de   : > { %v974_v40 = vpack.c.bf16 %v695_v5, %v693_v0  ;;  %v975_v41 = vpack.c.bf16 %v738_v2, %v736_v1  ;;  %v697_v42 = vpop.f32.mrb[2].mxu0  ;;  %v740_v43 = vpop.f32.mrb[2].mxu1 }
 0x1df   : > { %v699_v44 = vpop.f32.mrb[3].mxu0  ;;  %v742_v45 = vpop.f32.mrb[3].mxu1 }
 0x1e0   : > { %769 = vst [vmem:[%s226_s19] sm:$0xff] %v974_v40  ;;  %770 = vst [vmem:[%s226_s19 + $0x8] sm:$0xff] %v975_v41  ;;  %v976_v46 = vpack.c.bf16 %v699_v44, %v697_v42  ;;  %v977_v47 = vpack.c.bf16 %v742_v45, %v740_v43 }
 0x1e2   : > { %771 = vst [vmem:[%s226_s19 + $0x10] sm:$0xff] %v976_v46  ;;  %772 = vst [vmem:[%s226_s19 + $0x18] sm:$0xff] %v977_v47 }
 0x1e3   : > { %1229 = shalt.err (!%p1226_p8)
}
 0x1e4   : > { %s1230_s29 = scalar_lea.hbm %s1599_s5, 512  ;;  %s1234_s20 = scalar_lea.hbm %s1651_s3, 1024 }
 0x1e5   : > { %p1231_p0 = scmp.ne.s32.totalorder %s1599_s5, %s1230_s29  ;;  %p1235_p12 = scmp.lt.u32.totalorder %s1599_s5, %s1651_s3 }
 0x1e6   : > { %p1236_p5 = scmp.lt.u32.totalorder %s1234_s20, %s1230_s29  ;;  %p1238_p9 = scmp.lt.u32.totalorder %s1230_s29, %s1599_s5 }
 0x1e7   : > { %p1232_p2 = pnand %p1231_p0, %p1672_p11 }
 0x1e8   : > { %p1237_p10 = por %p1236_p5, %p1235_p12 }
 0x1e9   : > { %p1233_p7 = pneg %p1232_p2 }
 0x1ea   : > { %p1239_p13 = por %p1238_p9, %p1237_p10 }
 0x1ec   : > { %p1240_p4 = pnand %p1239_p13, %p1233_p7 }
 0x1ee   : > { %1243 = shalt.err (!%p1240_p4)
}
 0x1ef   : > { %s1310_s19 = smov 256   ;;  %s1311_s11 = smov 512  }
 0x1f0   : > { %s1312_s26 = smov 16  }
 0x1f1   : > { %985 = dma.vmem_to_hbm [thread:$0]  (%p1672_p11), %s1594_s10, 512, %s1599_s5, %s774_s15, %s1310_s19, %s1311_s11, %s1312_s26  }
 0x1f2 PF: > { %s805_s4 = sand.u32 1, %s1282_s12   ;;  %p1673_p1 = scmp.ne.s32.totalorder %s1663_s24, 0 }
 0x1f3   : > { %p1674_p3 = scmp.ge.s32.totalorder %s1302_s17, 2  ;;  %s806_s27 = scalar_lea.sflag [#allocation4], %s805_s4 }
 0x1f5   : > { %p996_p6 = pnand %p1674_p3, %p1673_p1 }
 0x1f7   : > { %1277 = dma.done.wait (!%p996_p6), %s806_s27, 512  }
 0x1f8   : > { %1279 = vsyncadd (!%p996_p6), %s806_s27, 4294966784  ;;  %s20_s17 = sadd.s32 1, %s1302_s17   ;;  %s1675_s12 = smov %s1286_s13 }
 0x1f9   : > { %p17_p8 = scmp.ge.s32.totalorder %s20_s17, 4   ;;  %s1676_s13 = smov %s1290_s14 }
 0x1fa   : > { %s1677_s14 = smov %s1454_s21  ;;  %s1678_s15 = smov %s1298_s16 }
 0x1fb   : > { %s1679_s16 = smov %s1681_s30  ;;  %19 = sbr.rel (!%p17_p8) target bundleno = 7 (0x7), region = 83 }
 0x202   :  { %811 = vsyncpa [#allocation3], 1 }
 0x203   :  { %813 = vsyncpa [#allocation3 + $0x1], 1 }
 0x204   :  { %814 = vsyncpa [#allocation6], 1 }
 0x205   :  { %816 = vsyncpa [#allocation6 + $0x1], 1 }
 0x206   :  { %817 = vsyncpa [#allocation4], 1 }
 0x207   :  { %819 = vsyncpa [#allocation4 + $0x1], 1 }

</bundles_post_ra>
